<compile_context>
chip_gen: v5e
topology: v5e:2x2
jax: 0.10.0
libtpu: 0.0.40
codegen_flags: <defaults>
</compile_context>

<pallas_src>
import functools
import math

import numpy as np
import jax
import jax.numpy as jnp
from jax import lax
from jax.experimental import pallas as pl
from jax.experimental.pallas import tpu as pltpu

DIM_EMBED = 32
DIM_FF = 32
NUM_HEADS = 2
DIM_HEAD = DIM_EMBED // NUM_HEADS
SEQ_LEN = 12
EPS = 1e-5                                   # nn.LayerNorm default eps

_VEC_ROWS = 8                                # 7 packed (1, D) vectors, padded to 8 sublanes
_W_LANES = (2 + NUM_HEADS) * DIM_EMBED       # 128 lanes: [Wq*s | Wk | Wv'_0 | Wv'_1]
_W_ROWS = 3 * DIM_EMBED + 8                  # 104 rows: QKV' / W1 / W2 / bias row + pad
_NEG = -1e30                                 # finite mask bias (no NaN from -inf - max)
_MAX_ROWS_PER_STEP = 1024                    # (m,m) f32 scores must stay well inside VMEM
                                             # (re-derived for v7x's 64 MiB); beyond this,
                                             # tile the KV axis flash-style.


def _round_up(n, k):
    return (n + k - 1) // k * k


def _layernorm(x, g, b):
    mu = jnp.mean(x, axis=-1, keepdims=True)
    var = jnp.mean((x - mu) ** 2, axis=-1, keepdims=True)
    return (x - mu) * lax.rsqrt(var + EPS) * g + b


def block_kernel(x_ref, smalls_ref, w_ref, o_ref, *, m):
    """Whole batch in one step, flattened to (m, DIM_EMBED) with m = B*SEQ_LEN."""
    D, DH, DF = DIM_EMBED, DIM_HEAD, DIM_FF
    x = x_ref[...]                                   # (m, D)
    sm = smalls_ref[...]                             # (8 + m_pad, max(D, m))
    w = w_ref[...]                                   # (104, 128)

    ln1_g, ln1_b = sm[0:1, 0:D], sm[1:2, 0:D]
    bfc          = sm[2:3, 0:D]                      # bfc + sum_h bv_h @ Wfc_h (folded)
    ln2_g, ln2_b = sm[3:4, 0:D], sm[4:5, 0:D]
    b1, b2       = sm[5:6, 0:DF], sm[6:7, 0:D]
    bias = sm[_VEC_ROWS:_VEC_ROWS + m, 0:m]          # (m, m) additive mask, baked constant

    # ---------------- attention branch: x + MHA(LN1(x)) ----------------
    xn = _layernorm(x, ln1_g, ln1_b)
    # One lane-dense 128-wide MXU push: [q*s | k | v'_0 | v'_1]; fused bias row.
    qkv = (jnp.dot(xn, w[0:D, :], preferred_element_type=jnp.float32)
           + w[3 * D:3 * D + 1, :])                  # (m, 128)
    q_all = qkv[:, 0:D]
    k_all = qkv[:, D:2 * D]
    # NOTE: per-head lane-offset slices below may cost an XLU relayout; if the
    # bundle dump shows rotates on the critical path, switch to per-head dots
    # (each result then lands at lane 0) — extra MXU pushes are ~free here.

    attn = None
    for h in range(NUM_HEADS):                       # static unroll (2 heads)
        hs = slice(h * DH, (h + 1) * DH)
        # q @ k^T without materializing the transpose.
        s = lax.dot_general(q_all[:, hs], k_all[:, hs], (((1,), (1,)), ((), ())),
                            preferred_element_type=jnp.float32)        # (m, m)
        s = s + bias                                                    # mask = +constant
        s = s - jnp.max(s, axis=-1, keepdims=True)                      # stable softmax
        p = jnp.exp(s)
        p = p * pl.reciprocal(jnp.sum(p, axis=-1, keepdims=True), approx=True)
        vh = qkv[:, (2 + h) * D:(3 + h) * D]                            # (m, D), Wfc folded
        ho = jnp.dot(p, vh, preferred_element_type=jnp.float32)
        attn = ho if attn is None else attn + ho
    x = x + attn + bfc

    # ---------------- feed-forward branch: x + FF(LN2(x)) ----------------
    xn2 = _layernorm(x, ln2_g, ln2_b)
    h1 = jnp.maximum(jnp.dot(xn2, w[D:2 * D, 0:DF],
                             preferred_element_type=jnp.float32) + b1, 0.0)
    ff = jnp.dot(h1, w[2 * D:3 * D, 0:D], preferred_element_type=jnp.float32) + b2

    o_ref[...] = x + ff


def pack_params(params, batch):
    """One-time fold/fuse/pack: QKV' weight slab + packed small vectors + mask bias."""
    (ln1_g, ln1_b, wq, bq, wk, bk, wv, bv, wfc, bfc,
     ln2_g, ln2_b, w1, b1, w2, b2) = params
    assert DIM_FF <= DIM_EMBED, "packed vector rows assume DIM_FF <= DIM_EMBED"
    D = DIM_EMBED
    m = batch * SEQ_LEN
    c = 1.0 / math.sqrt(DIM_HEAD)

    # Fold Wfc into per-head V projections; fold bv@Wfc into the output bias
    # (valid because every softmax row sums to 1 — diagonal is always unmasked).
    wv_f, bfc_f = [], bfc
    for h in range(NUM_HEADS):
        sl = slice(h * DIM_HEAD, (h + 1) * DIM_HEAD)
        wv_f.append(wv[:, sl] @ wfc[sl, :])                      # (D, D)
        bfc_f = bfc_f + bv[:, sl] @ wfc[sl, :]
    wqkv = jnp.concatenate([wq * c, wk] + wv_f, axis=1)          # (D, 4D) = (32, 128)
    qkv_bias = jnp.concatenate(
        [bq * c, bk, jnp.zeros((1, NUM_HEADS * D), jnp.float32)], axis=1)   # (1, 128)

    # Weight slab: every sub-block starts at lane 0 and a sublane multiple of 8.
    pad_lanes = lambda a: jnp.pad(a, ((0, 0), (0, _W_LANES - a.shape[1])))
    wslab = jnp.concatenate(
        [wqkv, pad_lanes(w1), pad_lanes(w2), pad_lanes(qkv_bias),
         jnp.zeros((_W_ROWS - 3 * D - 1, _W_LANES), jnp.float32)], axis=0
    ).astype(jnp.float32)                                        # (104, 128)

    # Packed small vectors (7 rows -> 8) + the additive attention-mask bias.
    lanes = max(D, m)
    vecs = jnp.concatenate(
        [ln1_g, ln1_b, bfc_f, ln2_g, ln2_b,
         jnp.pad(b1, ((0, 0), (0, D - DIM_FF))), b2,
         jnp.zeros((_VEC_ROWS - 7, D), jnp.float32)], axis=0)    # (8, D)
    vecs = jnp.pad(vecs, ((0, 0), (0, lanes - D)))

    # Block-diagonal (same batch element) + causal mask as a numpy constant bias.
    r = np.arange(m)
    allowed = ((r[:, None] // SEQ_LEN == r[None, :] // SEQ_LEN)
               & (r[None, :] <= r[:, None]))
    bias = np.where(allowed, 0.0, _NEG).astype(np.float32)       # (m, m)
    bias = np.pad(bias, ((0, _round_up(m, 8) - m), (0, lanes - m)))
    smalls = jnp.concatenate([vecs, jnp.asarray(bias)], axis=0).astype(jnp.float32)

    return smalls, wslab


@functools.lru_cache(maxsize=None)
def _make_block_call(m):
    """Build the pallas_call once per flattened row count m = B*SEQ_LEN."""
    assert m <= _MAX_ROWS_PER_STEP, "tile the KV axis (flash-style) for large batches"
    smalls_rows = _VEC_ROWS + _round_up(m, 8)
    lanes = max(DIM_EMBED, m)
    kernel = functools.partial(block_kernel, m=m)
    return pl.pallas_call(
        kernel,
        out_shape=jax.ShapeDtypeStruct((m, DIM_EMBED), jnp.float32),
        grid_spec=pltpu.PrefetchScalarGridSpec(
            num_scalar_prefetch=0,
            grid=(1,),                                   # single fat step; grid is a loop
            in_specs=[
                pl.BlockSpec((m, DIM_EMBED), lambda i: (0, 0)),        # x (flattened)
                pl.BlockSpec((smalls_rows, lanes), lambda i: (0, 0)),  # vecs + mask bias
                pl.BlockSpec((_W_ROWS, _W_LANES), lambda i: (0, 0)),   # weight slab
            ],
            out_specs=pl.BlockSpec((m, DIM_EMBED), lambda i: (0, 0)),
        ),
        compiler_params=pltpu.CompilerParams(dimension_semantics=("arbitrary",)),
    )


@jax.jit
def block_forward(x, smalls, wslab):
    b, s, d = x.shape
    m = b * s
    out = _make_block_call(m)(x.reshape(m, d), smalls, wslab)
    return out.reshape(b, s, d)


def reference_block(x, params):
    """Pure-JAX mirror of the PyTorch module (unfused params)."""
    (ln1_g, ln1_b, wq, bq, wk, bk, wv, bv, wfc, bfc,
     ln2_g, ln2_b, w1, b1, w2, b2) = params
    xn = _layernorm(x, ln1_g[0], ln1_b[0])
    q = xn @ wq + bq[0]
    k = xn @ wk + bk[0]
    v = xn @ wv + bv[0]
    causal = jnp.triu(jnp.ones((SEQ_LEN, SEQ_LEN), bool), k=1)
    outs = []
    for h in range(NUM_HEADS):
        sl = slice(h * DIM_HEAD, (h + 1) * DIM_HEAD)
        s = jnp.einsum("bqd,bkd->bqk", q[..., sl], k[..., sl]) / (DIM_HEAD ** 0.5)
        s = jnp.where(causal, -jnp.inf, s)
        p = jax.nn.softmax(s, axis=-1)
        outs.append(jnp.einsum("bqk,bkd->bqd", p, v[..., sl]))
    attn = jnp.concatenate(outs, axis=-1) @ wfc + bfc[0]
    x = x + attn
    xn2 = _layernorm(x, ln2_g[0], ln2_b[0])
    ff = jnp.maximum(xn2 @ w1 + b1[0], 0.0) @ w2 + b2[0]
    return x + ff


if __name__ == "__main__":
    key = jax.random.PRNGKey(0)
    keys = jax.random.split(key, 16)
    B = 2

    x = jax.random.normal(keys[0], (B, SEQ_LEN, DIM_EMBED), jnp.float32)

    scale = 0.1
    params = (
        jnp.ones((1, DIM_EMBED), jnp.float32),                                   # ln1 gamma
        jnp.zeros((1, DIM_EMBED), jnp.float32),                                  # ln1 beta
        scale * jax.random.normal(keys[1], (DIM_EMBED, DIM_EMBED), jnp.float32), # Wq
        scale * jax.random.normal(keys[2], (1, DIM_EMBED), jnp.float32),         # bq
        scale * jax.random.normal(keys[3], (DIM_EMBED, DIM_EMBED), jnp.float32), # Wk
        scale * jax.random.normal(keys[4], (1, DIM_EMBED), jnp.float32),         # bk
        scale * jax.random.normal(keys[5], (DIM_EMBED, DIM_EMBED), jnp.float32), # Wv
        scale * jax.random.normal(keys[6], (1, DIM_EMBED), jnp.float32),         # bv
        scale * jax.random.normal(keys[7], (DIM_EMBED, DIM_EMBED), jnp.float32), # Wfc
        scale * jax.random.normal(keys[8], (1, DIM_EMBED), jnp.float32),         # bfc
        jnp.ones((1, DIM_EMBED), jnp.float32),                                   # ln2 gamma
        jnp.zeros((1, DIM_EMBED), jnp.float32),                                  # ln2 beta
        scale * jax.random.normal(keys[9], (DIM_EMBED, DIM_FF), jnp.float32),    # ff W1
        scale * jax.random.normal(keys[10], (1, DIM_FF), jnp.float32),           # ff b1
        scale * jax.random.normal(keys[11], (DIM_FF, DIM_EMBED), jnp.float32),   # ff W2
        scale * jax.random.normal(keys[12], (1, DIM_EMBED), jnp.float32),        # ff b2
    )

    smalls, wslab = pack_params(params, B)       # one-time fold/fuse/pack (not per call)
    out = block_forward(x, smalls, wslab)        # jit + lru_cache: trace/lower only once
    jax.block_until_ready(out)

    ref = reference_block(x, params)
    assert out.shape == (B, SEQ_LEN, DIM_EMBED)
    # tolerance accounts for the approx (EUP) reciprocal in the softmax normalization
    assert jnp.allclose(out, ref, atol=2e-3, rtol=2e-3), "mismatch vs pure-JAX reference"

    print("KERNEL_OK")
</pallas_src>

<mosaic_0001>
module attributes {stable_mosaic.version = 11 : i64} {
  func.func @block_kernel(%arg0: i32, %arg1: memref<24x32xf32, #tpu.memory_space<vmem>>, %arg2: memref<32x32xf32, #tpu.memory_space<vmem>>, %arg3: memref<104x128xf32, #tpu.memory_space<vmem>>, %arg4: memref<24x32xf32, #tpu.memory_space<vmem>>) attributes {dimension_semantics = [#tpu.dimension_semantics<arbitrary>], iteration_bounds = array<i64: 1>, scalar_prefetch = 0 : i64, scratch_operands = 0 : i64, tpu.core_type = #tpu.core_type<tc>, window_params = [{pipeline_mode = #tpu.pipeline_mode<synchronous>, transform_indices = @transform_0, window_bounds = array<i64: 24, 32>}, {pipeline_mode = #tpu.pipeline_mode<synchronous>, transform_indices = @transform_1, window_bounds = array<i64: 32, 32>}, {pipeline_mode = #tpu.pipeline_mode<synchronous>, transform_indices = @transform_2, window_bounds = array<i64: 104, 128>}, {pipeline_mode = #tpu.pipeline_mode<synchronous>, transform_indices = @transform_3, window_bounds = array<i64: 24, 32>}]} {
    %c0 = arith.constant 0 : index
    %c0_0 = arith.constant 0 : index
    %0 = vector.load %arg1[%c0, %c0_0] : memref<24x32xf32, #tpu.memory_space<vmem>>, vector<24x32xf32>
    %c0_1 = arith.constant 0 : index
    %c0_2 = arith.constant 0 : index
    %1 = vector.load %arg2[%c0_1, %c0_2] : memref<32x32xf32, #tpu.memory_space<vmem>>, vector<32x32xf32>
    %c0_3 = arith.constant 0 : index
    %c0_4 = arith.constant 0 : index
    %2 = vector.load %arg3[%c0_3, %c0_4] : memref<104x128xf32, #tpu.memory_space<vmem>>, vector<104x128xf32>
    %3 = vector.extract_strided_slice %1 {offsets = [0, 0], sizes = [1, 32], strides = [1, 1]} : vector<32x32xf32> to vector<1x32xf32>
    %4 = vector.extract_strided_slice %1 {offsets = [1, 0], sizes = [1, 32], strides = [1, 1]} : vector<32x32xf32> to vector<1x32xf32>
    %5 = vector.extract_strided_slice %1 {offsets = [2, 0], sizes = [1, 32], strides = [1, 1]} : vector<32x32xf32> to vector<1x32xf32>
    %6 = vector.extract_strided_slice %1 {offsets = [3, 0], sizes = [1, 32], strides = [1, 1]} : vector<32x32xf32> to vector<1x32xf32>
    %7 = vector.extract_strided_slice %1 {offsets = [4, 0], sizes = [1, 32], strides = [1, 1]} : vector<32x32xf32> to vector<1x32xf32>
    %8 = vector.extract_strided_slice %1 {offsets = [5, 0], sizes = [1, 32], strides = [1, 1]} : vector<32x32xf32> to vector<1x32xf32>
    %9 = vector.extract_strided_slice %1 {offsets = [6, 0], sizes = [1, 32], strides = [1, 1]} : vector<32x32xf32> to vector<1x32xf32>
    %10 = vector.extract_strided_slice %1 {offsets = [8, 0], sizes = [24, 24], strides = [1, 1]} : vector<32x32xf32> to vector<24x24xf32>
    %cst = arith.constant dense<0.000000e+00> : vector<24xf32>
    %11 = vector.multi_reduction <add>, %0, %cst [1] : vector<24x32xf32> to vector<24xf32>
    %12 = vector.shape_cast %11 : vector<24xf32> to vector<24x1xf32>
    %cst_5 = arith.constant 3.200000e+01 : f32
    %13 = vector.broadcast %cst_5 : f32 to vector<24x1xf32>
    %14 = arith.divf %12, %13 : vector<24x1xf32>
    %15 = vector.broadcast %14 : vector<24x1xf32> to vector<24x32xf32>
    %16 = arith.subf %0, %15 : vector<24x32xf32>
    %17 = arith.mulf %16, %16 : vector<24x32xf32>
    %cst_6 = arith.constant dense<0.000000e+00> : vector<24xf32>
    %18 = vector.multi_reduction <add>, %17, %cst_6 [1] : vector<24x32xf32> to vector<24xf32>
    %19 = vector.shape_cast %18 : vector<24xf32> to vector<24x1xf32>
    %cst_7 = arith.constant 3.200000e+01 : f32
    %20 = vector.broadcast %cst_7 : f32 to vector<24x1xf32>
    %21 = arith.divf %19, %20 : vector<24x1xf32>
    %22 = vector.broadcast %14 : vector<24x1xf32> to vector<24x32xf32>
    %23 = arith.subf %0, %22 : vector<24x32xf32>
    %cst_8 = arith.constant 9.99999974E-6 : f32
    %24 = vector.broadcast %cst_8 : f32 to vector<24x1xf32>
    %25 = arith.addf %21, %24 : vector<24x1xf32>
    %26 = math.rsqrt %25 : vector<24x1xf32>
    %27 = vector.broadcast %26 : vector<24x1xf32> to vector<24x32xf32>
    %28 = arith.mulf %23, %27 : vector<24x32xf32>
    %29 = vector.broadcast %3 : vector<1x32xf32> to vector<24x32xf32>
    %30 = arith.mulf %28, %29 : vector<24x32xf32>
    %31 = vector.broadcast %4 : vector<1x32xf32> to vector<24x32xf32>
    %32 = arith.addf %30, %31 : vector<24x32xf32>
    %33 = vector.extract_strided_slice %2 {offsets = [0, 0], sizes = [32, 128], strides = [1, 1]} : vector<104x128xf32> to vector<32x128xf32>
    %cst_9 = arith.constant dense<0.000000e+00> : vector<24x128xf32>
    %34 = tpu.matmul %32, %33, %cst_9 {dimension_numbers = #tpu.dot_dimension_numbers<[1], [0], [0], [1], [0, 0, 1, 1], [], []>} : vector<24x32xf32>, vector<32x128xf32>, vector<24x128xf32> -> vector<24x128xf32>
    %35 = vector.extract_strided_slice %2 {offsets = [96, 0], sizes = [1, 128], strides = [1, 1]} : vector<104x128xf32> to vector<1x128xf32>
    %36 = vector.broadcast %35 : vector<1x128xf32> to vector<24x128xf32>
    %37 = arith.addf %34, %36 : vector<24x128xf32>
    %38 = vector.extract_strided_slice %37 {offsets = [0, 0], sizes = [24, 32], strides = [1, 1]} : vector<24x128xf32> to vector<24x32xf32>
    %39 = vector.extract_strided_slice %37 {offsets = [0, 32], sizes = [24, 32], strides = [1, 1]} : vector<24x128xf32> to vector<24x32xf32>
    %40 = vector.extract_strided_slice %38 {offsets = [0, 0], sizes = [24, 16], strides = [1, 1]} : vector<24x32xf32> to vector<24x16xf32>
    %41 = vector.extract_strided_slice %39 {offsets = [0, 0], sizes = [24, 16], strides = [1, 1]} : vector<24x32xf32> to vector<24x16xf32>
    %cst_10 = arith.constant dense<0.000000e+00> : vector<24x24xf32>
    %42 = tpu.matmul %40, %41, %cst_10 {dimension_numbers = #tpu.dot_dimension_numbers<[1], [1], [0], [0], [0, 0, 1, 0], [], []>} : vector<24x16xf32>, vector<24x16xf32>, vector<24x24xf32> -> vector<24x24xf32>
    %43 = arith.addf %42, %10 : vector<24x24xf32>
    %cst_11 = arith.constant dense<0xFF800000> : vector<24xf32>
    %44 = vector.multi_reduction <maximumf>, %43, %cst_11 [1] : vector<24x24xf32> to vector<24xf32>
    %45 = vector.shape_cast %44 : vector<24xf32> to vector<24x1xf32>
    %46 = vector.broadcast %45 : vector<24x1xf32> to vector<24x24xf32>
    %47 = arith.subf %43, %46 : vector<24x24xf32>
    %48 = math.exp %47 : vector<24x24xf32>
    %cst_12 = arith.constant dense<0.000000e+00> : vector<24xf32>
    %49 = vector.multi_reduction <add>, %48, %cst_12 [1] : vector<24x24xf32> to vector<24xf32>
    %50 = vector.shape_cast %49 : vector<24xf32> to vector<24x1xf32>
    %51 = tpu.reciprocal %50 {approx = true} : vector<24x1xf32> -> vector<24x1xf32>
    %52 = vector.broadcast %51 : vector<24x1xf32> to vector<24x24xf32>
    %53 = arith.mulf %48, %52 : vector<24x24xf32>
    %54 = vector.extract_strided_slice %37 {offsets = [0, 64], sizes = [24, 32], strides = [1, 1]} : vector<24x128xf32> to vector<24x32xf32>
    %cst_13 = arith.constant dense<0.000000e+00> : vector<24x32xf32>
    %55 = tpu.matmul %53, %54, %cst_13 {dimension_numbers = #tpu.dot_dimension_numbers<[1], [0], [0], [1], [0, 0, 1, 1], [], []>} : vector<24x24xf32>, vector<24x32xf32>, vector<24x32xf32> -> vector<24x32xf32>
    %56 = vector.extract_strided_slice %38 {offsets = [0, 16], sizes = [24, 16], strides = [1, 1]} : vector<24x32xf32> to vector<24x16xf32>
    %57 = vector.extract_strided_slice %39 {offsets = [0, 16], sizes = [24, 16], strides = [1, 1]} : vector<24x32xf32> to vector<24x16xf32>
    %cst_14 = arith.constant dense<0.000000e+00> : vector<24x24xf32>
    %58 = tpu.matmul %56, %57, %cst_14 {dimension_numbers = #tpu.dot_dimension_numbers<[1], [1], [0], [0], [0, 0, 1, 0], [], []>} : vector<24x16xf32>, vector<24x16xf32>, vector<24x24xf32> -> vector<24x24xf32>
    %59 = arith.addf %58, %10 : vector<24x24xf32>
    %cst_15 = arith.constant dense<0xFF800000> : vector<24xf32>
    %60 = vector.multi_reduction <maximumf>, %59, %cst_15 [1] : vector<24x24xf32> to vector<24xf32>
    %61 = vector.shape_cast %60 : vector<24xf32> to vector<24x1xf32>
    %62 = vector.broadcast %61 : vector<24x1xf32> to vector<24x24xf32>
    %63 = arith.subf %59, %62 : vector<24x24xf32>
    %64 = math.exp %63 : vector<24x24xf32>
    %cst_16 = arith.constant dense<0.000000e+00> : vector<24xf32>
    %65 = vector.multi_reduction <add>, %64, %cst_16 [1] : vector<24x24xf32> to vector<24xf32>
    %66 = vector.shape_cast %65 : vector<24xf32> to vector<24x1xf32>
    %67 = tpu.reciprocal %66 {approx = true} : vector<24x1xf32> -> vector<24x1xf32>
    %68 = vector.broadcast %67 : vector<24x1xf32> to vector<24x24xf32>
    %69 = arith.mulf %64, %68 : vector<24x24xf32>
    %70 = vector.extract_strided_slice %37 {offsets = [0, 96], sizes = [24, 32], strides = [1, 1]} : vector<24x128xf32> to vector<24x32xf32>
    %cst_17 = arith.constant dense<0.000000e+00> : vector<24x32xf32>
    %71 = tpu.matmul %69, %70, %cst_17 {dimension_numbers = #tpu.dot_dimension_numbers<[1], [0], [0], [1], [0, 0, 1, 1], [], []>} : vector<24x24xf32>, vector<24x32xf32>, vector<24x32xf32> -> vector<24x32xf32>
    %72 = arith.addf %55, %71 : vector<24x32xf32>
    %73 = arith.addf %0, %72 : vector<24x32xf32>
    %74 = vector.broadcast %5 : vector<1x32xf32> to vector<24x32xf32>
    %75 = arith.addf %73, %74 : vector<24x32xf32>
    %cst_18 = arith.constant dense<0.000000e+00> : vector<24xf32>
    %76 = vector.multi_reduction <add>, %75, %cst_18 [1] : vector<24x32xf32> to vector<24xf32>
    %77 = vector.shape_cast %76 : vector<24xf32> to vector<24x1xf32>
    %cst_19 = arith.constant 3.200000e+01 : f32
    %78 = vector.broadcast %cst_19 : f32 to vector<24x1xf32>
    %79 = arith.divf %77, %78 : vector<24x1xf32>
    %80 = vector.broadcast %79 : vector<24x1xf32> to vector<24x32xf32>
    %81 = arith.subf %75, %80 : vector<24x32xf32>
    %82 = arith.mulf %81, %81 : vector<24x32xf32>
    %cst_20 = arith.constant dense<0.000000e+00> : vector<24xf32>
    %83 = vector.multi_reduction <add>, %82, %cst_20 [1] : vector<24x32xf32> to vector<24xf32>
    %84 = vector.shape_cast %83 : vector<24xf32> to vector<24x1xf32>
    %cst_21 = arith.constant 3.200000e+01 : f32
    %85 = vector.broadcast %cst_21 : f32 to vector<24x1xf32>
    %86 = arith.divf %84, %85 : vector<24x1xf32>
    %87 = vector.broadcast %79 : vector<24x1xf32> to vector<24x32xf32>
    %88 = arith.subf %75, %87 : vector<24x32xf32>
    %cst_22 = arith.constant 9.99999974E-6 : f32
    %89 = vector.broadcast %cst_22 : f32 to vector<24x1xf32>
    %90 = arith.addf %86, %89 : vector<24x1xf32>
    %91 = math.rsqrt %90 : vector<24x1xf32>
    %92 = vector.broadcast %91 : vector<24x1xf32> to vector<24x32xf32>
    %93 = arith.mulf %88, %92 : vector<24x32xf32>
    %94 = vector.broadcast %6 : vector<1x32xf32> to vector<24x32xf32>
    %95 = arith.mulf %93, %94 : vector<24x32xf32>
    %96 = vector.broadcast %7 : vector<1x32xf32> to vector<24x32xf32>
    %97 = arith.addf %95, %96 : vector<24x32xf32>
    %98 = vector.extract_strided_slice %2 {offsets = [32, 0], sizes = [32, 32], strides = [1, 1]} : vector<104x128xf32> to vector<32x32xf32>
    %cst_23 = arith.constant dense<0.000000e+00> : vector<24x32xf32>
    %99 = tpu.matmul %97, %98, %cst_23 {dimension_numbers = #tpu.dot_dimension_numbers<[1], [0], [0], [1], [0, 0, 1, 1], [], []>} : vector<24x32xf32>, vector<32x32xf32>, vector<24x32xf32> -> vector<24x32xf32>
    %100 = vector.broadcast %8 : vector<1x32xf32> to vector<24x32xf32>
    %101 = arith.addf %99, %100 : vector<24x32xf32>
    %cst_24 = arith.constant 0.000000e+00 : f32
    %102 = vector.broadcast %cst_24 : f32 to vector<24x32xf32>
    %103 = arith.maximumf %101, %102 : vector<24x32xf32>
    %104 = vector.extract_strided_slice %2 {offsets = [64, 0], sizes = [32, 32], strides = [1, 1]} : vector<104x128xf32> to vector<32x32xf32>
    %cst_25 = arith.constant dense<0.000000e+00> : vector<24x32xf32>
    %105 = tpu.matmul %103, %104, %cst_25 {dimension_numbers = #tpu.dot_dimension_numbers<[1], [0], [0], [1], [0, 0, 1, 1], [], []>} : vector<24x32xf32>, vector<32x32xf32>, vector<24x32xf32> -> vector<24x32xf32>
    %106 = vector.broadcast %9 : vector<1x32xf32> to vector<24x32xf32>
    %107 = arith.addf %105, %106 : vector<24x32xf32>
    %108 = arith.addf %75, %107 : vector<24x32xf32>
    %c0_26 = arith.constant 0 : index
    %c0_27 = arith.constant 0 : index
    %109 = vector.load %arg4[%c0_26, %c0_27] : memref<24x32xf32, #tpu.memory_space<vmem>>, vector<24x32xf32>
    tpu.vector_store %arg4[%c0_26, %c0_27], %108 {strides = array<i32>} : memref<24x32xf32, #tpu.memory_space<vmem>>, vector<24x32xf32>,
    return
  }
  func.func @transform_0(%arg0: i32) -> (i32, i32) {
    %c0_i32 = arith.constant 0 : i32
    %c0_i32_0 = arith.constant 0 : i32
    %c0_i32_1 = arith.constant 0 : i32
    return %c0_i32, %c0_i32_0 : i32, i32
  }
  func.func @transform_1(%arg0: i32) -> (i32, i32) {
    %c0_i32 = arith.constant 0 : i32
    %c0_i32_0 = arith.constant 0 : i32
    %c0_i32_1 = arith.constant 0 : i32
    return %c0_i32, %c0_i32_0 : i32, i32
  }
  func.func @transform_2(%arg0: i32) -> (i32, i32) {
    %c0_i32 = arith.constant 0 : i32
    %c0_i32_0 = arith.constant 0 : i32
    %c0_i32_1 = arith.constant 0 : i32
    return %c0_i32, %c0_i32_0 : i32, i32
  }
  func.func @transform_3(%arg0: i32) -> (i32, i32) {
    %c0_i32 = arith.constant 0 : i32
    %c0_i32_0 = arith.constant 0 : i32
    %c0_i32_1 = arith.constant 0 : i32
    return %c0_i32, %c0_i32_0 : i32, i32
  }
}

</mosaic_0001>

<bundles_post_ra>
// kernel: block_forward.1
= control target key start
LH: loop header
LB: loop body
LE: loop exit
PB: predicated region body
PF: predicated region fallthrough
CT: control target
= control target key end

     0   :  { %8 = vsyncpa [#allocation3], 0  ;;  %s701_s15 = smov [#allocation2]   ;;  %s702_s17 = smov 128   ;;  %s929_s0 = inlined_call_operand.vmem [shape: f32[24,32], index: 0, kind: input, shape index: {}]   ;;  %s930_s1 = inlined_call_operand.hbm [shape: f32[32,32], index: 1, kind: input, shape index: {}]   ;;  %s931_s2 = inlined_call_operand.vmem [shape: f32[104,128], index: 2, kind: input, shape index: {}]   ;;  %s932_s3 = inlined_call_operand.vmem [shape: f32[24,32], index: 3, kind: output, shape index: {}]  }
   0x1   :  { %s15_s14 = sshll.u32 %s930_s1, 4  ;;  %s17_s16 = sshll.u32 %s701_s15, 4  ;;  %s16_s14 = int_to_ptr.hbm [resolvable:$true] %s15_s14  ;;  %s18_s16 = int_to_ptr.vmem [resolvable:$true] %s17_s16 }
   0x2   :  { %s703_s18 = smov 8  }
   0x3   :  { %23 = dma.hbm_to_vmem [thread:$0]  %s16_s14, 512, %s18_s16, [#allocation3], %s702_s17, %s702_s17, %s703_s18  }
   0x4   :  { %699 = dma.done.wait [#allocation3], 512  }
   0x5   :  { %700 = vsyncadd [#allocation3], 4294966784  ;;  %vm50_vm0 = vcmask 261120   ;;  %v736_v0 = vld [vmem:[%s929_s0] sm:$0xff]  ;;  %v741_v1 = vld [vmem:[%s929_s0 + $0x10] sm:$0xff]  ;;  %v704_v6 = vmov 32.0  }
   0x6   :  { %v51_v2 = vsel %vm50_vm0, %v736_v0, 0.0  ;;  %v57_v3 = vsel %vm50_vm0, %v741_v1, 0.0  ;;  %v750_v4 = vld [vmem:[%s929_s0 + $0x8] sm:$0xff]  ;;  %637 = vrcp.f32 %v704_v6  ;;  %v40_v28 = vld [vmem:[%s931_s2 + $0x18] sm:$0xff]  ;;  %v39_v29 = vld [vmem:[%s931_s2 + $0x10] sm:$0xff]  ;;  %s705_s6 = smov 96  }
   0x7   :  { %52 = vadd.xlane.f32.xlu0 %v51_v2  ;;  %58 = vadd.xlane.f32.xlu1 %v57_v3  ;;  %v54_v5 = vsel %vm50_vm0, %v750_v4, 0.0  ;;  %v38_v30 = vld [vmem:[%s931_s2 + $0x8] sm:$0xff]  ;;  %v37_v31 = vld [vmem:[%s931_s2] sm:$0xff]  ;;  %s706_s7 = smov 80   ;;  %s707_s8 = smov 112   ;;  %vm177_vm11 = vcmask 130048  }
   0x8   :  { %154 = vmatpush.msra.mxu0 %v40_v28  ;;  %v784_v45 = vld [vmem:[#allocation2] sm:$0xff]  ;;  %vm216_vm12 = vcmask 195584   ;;  %s708_s9 = smov 32   ;;  %s709_s10 = smov 64  }
   0x9   :  { %v124_v50 = vperm.slane %v784_v45, 0  ;;  %v128_v54 = vperm.slane %v784_v45, 1 }
   0xa   :  { %155 = vmatpush.msra.mxu0 %v39_v29 }
   0xc   :  { %v638_v7 = vpop.eup %637  ;;  %156 = vmatpush.msra.mxu0 %v38_v30 }
   0xd   :  { %v61_v8 = vmul.f32 32.0, %v638_v7  ;;  %vm65_vm1 = vweird.f32 %v638_v7 }
   0xe   :  { %157 = vmatpush.msra.mxu0 %v37_v31 }
   0xf   :  { %55 = vadd.xlane.f32.xlu0 %v54_v5  ;;  %v62_v9 = vsub.f32 1.0, %v61_v8 }
  0x11   :  { %v63_v10 = vmul.f32 %v638_v7, %v62_v9 }
  0x13   :  { %v64_v11 = vadd.f32 %v638_v7, %v63_v10 }
  0x15   :  { %v754_v12 = vsel %vm65_vm1, %v638_v7, %v64_v11 }
  0x7a   :  { %v53_v13 = vpop.xlane.xlu0 %52  ;;  %v59_v17 = vpop.xlane.xlu1 %58 }
  0x7b   :  { %v67_v14 = vmul.f32 %v754_v12, %v53_v13  ;;  %v69_v21 = vmul.f32 %v754_v12, %v59_v17 }
  0x7d   :  { %v70_v15 = vsub.f32 %v736_v0, %v67_v14  ;;  %v763_v23 = vsub.f32 %v741_v1, %v69_v21  ;;  %v49_v14 = vld [vmem:[%s931_s2 + $0x60] sm:$0xff] }
  0x7f   :  { %v73_v16 = vmul.f32 %v70_v15, %v70_v15  ;;  %v75_v26 = vmul.f32 %v763_v23, %v763_v23 }
  0x81   :  { %v76_v18 = vsel %vm50_vm0, %v73_v16, 0.0  ;;  %v82_v27 = vsel %vm50_vm0, %v75_v26, 0.0 }
  0x82   :  { %77 = vadd.xlane.f32.xlu1 %v76_v18  ;;  %v56_v19 = vpop.xlane.xlu0 %55 }
  0x83   :  { %v68_v20 = vmul.f32 %v754_v12, %v56_v19 }
  0x85   :  { %v71_v22 = vsub.f32 %v750_v4, %v68_v20 }
  0x87   :  { %v74_v24 = vmul.f32 %v71_v22, %v71_v22 }
  0x89   :  { %v79_v25 = vsel %vm50_vm0, %v74_v24, 0.0 }
  0x8a   :  { %80 = vadd.xlane.f32.xlu2 %v79_v25 }
  0x92   :  { %83 = vadd.xlane.f32.xlu2 %v82_v27 }
  0xf5   :  { %v78_v32 = vpop.xlane.xlu1 %77 }
  0xf6   :  { %v85_v33 = vmul.f32 %v78_v32, %v754_v12 }
  0xf8   :  { %v88_v34 = vadd.f32 1e-05, %v85_v33  ;;  %v34_v33 = vld [vmem:[#allocation2 + $0x8] sm:$0xff] }
  0xfa   :  { %639 = vrsqrt.f32 %v88_v34  ;;  %vm97_vm3 = vweird.f32 %v88_v34 }
  0xfd   :  { %v81_v35 = vpop.xlane.xlu2 %80 }
  0xfe   :  { %v86_v36 = vmul.f32 %v81_v35, %v754_v12 }
 0x100   :  { %v640_v37 = vpop.eup %639  ;;  %v89_v38 = vadd.f32 1e-05, %v86_v36 }
 0x101   :  { %v92_v39 = vmul.f32 %v640_v37, %v88_v34  ;;  %vm98_vm2 = vweird.f32 %v640_v37 }
 0x102   :  { %641 = vrsqrt.f32 %v89_v38  ;;  %vm99_vm4 = vmor %vm97_vm3, %vm98_vm2  ;;  %vm107_vm6 = vweird.f32 %v89_v38 }
 0x103   :  { %v93_v40 = vmul.f32 %v640_v37, %v92_v39  ;;  %v35_v39 = vld [vmem:[#allocation2 + $0x10] sm:$0xff] }
 0x105   :  { %v94_v41 = vmul.f32 0.5, %v93_v40  ;;  %v84_v42 = vpop.xlane.xlu2 %83 }
 0x106   :  { %v87_v43 = vmul.f32 %v84_v42, %v754_v12 }
 0x107   :  { %v95_v44 = vsub.f32 1.5, %v94_v41 }
 0x108   :  { %v642_v46 = vpop.eup %641  ;;  %v90_v47 = vadd.f32 1e-05, %v87_v43 }
 0x109   :  { %v96_v48 = vmul.f32 %v640_v37, %v95_v44  ;;  %v102_v49 = vmul.f32 %v642_v46, %v89_v38  ;;  %vm108_vm5 = vweird.f32 %v642_v46 }
 0x10a   :  { %643 = vrsqrt.f32 %v90_v47  ;;  %vm109_vm7 = vmor %vm107_vm6, %vm108_vm5  ;;  %vm117_vm9 = vweird.f32 %v90_v47 }
 0x10b   :  { %v100_v51 = vsel %vm99_vm4, %v640_v37, %v96_v48  ;;  %v103_v52 = vmul.f32 %v642_v46, %v102_v49 }
 0x10c   :  { %v121_v53 = vmul.f32 %v100_v51, %v70_v15  ;;  %v132_v15 = vperm.slane %v49_v14, 0 }
 0x10d   :  { %v104_v55 = vmul.f32 0.5, %v103_v52 }
 0x10e   :  { %v125_v56 = vmul.f32 %v124_v50, %v121_v53 }
 0x10f   :  { %v105_v57 = vsub.f32 1.5, %v104_v55 }
 0x110   :  { %v644_v58 = vpop.eup %643  ;;  %v129_v59 = vadd.f32 %v128_v54, %v125_v56 }
 0x111   :  { %v106_v60 = vmul.f32 %v642_v46, %v105_v57  ;;  %v112_v61 = vmul.f32 %v644_v58, %v90_v47  ;;  %vm118_vm8 = vweird.f32 %v644_v58 }
 0x112   :  { %588 = vmatmul.msk.f32.vlgmr.msra.gmra.mxu0 %vm50_vm0, %v129_v59  ;;  %vm119_vm10 = vmor %vm117_vm9, %vm118_vm8 }
 0x113   :  { %v110_v62 = vsel %vm109_vm7, %v642_v46, %v106_v60  ;;  %v113_v63 = vmul.f32 %v644_v58, %v112_v61  ;;  %v36_v46 = vld [vmem:[#allocation2 + $0x18] sm:$0xff] }
 0x114   :  { %v122_v2 = vmul.f32 %v110_v62, %v71_v22 }
 0x115   :  { %v114_v3 = vmul.f32 0.5, %v113_v63 }
 0x116   :  { %v126_v5 = vmul.f32 %v124_v50, %v122_v2 }
 0x117   :  { %v115_v6 = vsub.f32 1.5, %v114_v3 }
 0x118   :  { %v130_v7 = vadd.f32 %v128_v54, %v126_v5 }
 0x119   :  { %v116_v8 = vmul.f32 %v644_v58, %v115_v6 }
 0x11a   :  { %589 = vmatmul.msk.f32.gmra.mxu0 %vm50_vm0, %v130_v7 }
 0x11b   :  { %v120_v9 = vsel %vm119_vm10, %v644_v58, %v116_v8 }
 0x11c   :  { %v123_v10 = vmul.f32 %v120_v9, %v763_v23 }
 0x11e   :  { %v127_v11 = vmul.f32 %v124_v50, %v123_v10 }
 0x120   :  { %v131_v13 = vadd.f32 %v128_v54, %v127_v11 }
 0x122   :  { %590 = vmatmul.msk.f32.gmra.mxu0 %vm50_vm0, %v131_v13 }
 0x18f   :  { %v159_v16 = vpop.f32.mrf.mxu0 }
 0x190   :  { %v795_v17 = vadd.f32 %v159_v16, %v132_v15 }
 0x192   :  { %171 = vrot.lane.b32.xlu2 %v795_v17, %s705_s6 }
 0x197   :  { %v162_v18 = vpop.f32.mrf.mxu0 }
 0x198   :  { %v798_v19 = vadd.f32 %v162_v18, %v132_v15 }
 0x19a   :  { %258 = vrot.lane.b32.xlu2 %v798_v19, %s706_s7  ;;  %173 = vrot.lane.b32.xlu1 %v798_v19, %s705_s6 }
 0x19f   :  { %v165_v20 = vpop.f32.mrf.mxu0 }
 0x1a0   :  { %v166_v21 = vadd.f32 %v165_v20, %v132_v15 }
 0x1a2   :  { %252 = vrot.lane.b32.xlu2 %v798_v19, %s707_s8  ;;  %256 = vrot.lane.b32.xlu1 %v795_v17, %s706_s7  ;;  %v627_v53 = vpack.i.bf16 %v798_v19, %v166_v21 }
 0x1a3   :  { %175 = vrot.lane.b32.xlu0 %v166_v21, %s705_s6 }
 0x1aa   :  { %254 = vrot.lane.b32.xlu1 %v166_v21, %s707_s8 }
 0x1ab   :  { %260 = vrot.lane.b32.xlu0 %v166_v21, %s706_s7 }
 0x1b3   :  { %250 = vrot.lane.b32.xlu0 %v795_v17, %s707_s8 }
 0x1ec   :  { %v172_v23 = vpop.permute.xlu2 %171 }
 0x1f4   :  { %v259_v26 = vpop.permute.xlu2 %258 }
 0x1fc   :  { %v253_v29 = vpop.permute.xlu2 %252 }
 0x20c   :  { %v174_v24 = vpop.permute.xlu1 %173 }
 0x214   :  { %v257_v27 = vpop.permute.xlu1 %256 }
 0x215   :  { %v176_v22 = vpop.permute.xlu0 %175 }
 0x216   :  { %591 = vmatpush.xpose.msk.msra.mxu1 %vm177_vm11, %v176_v22  ;;  %615 = vmatpush.xpose.msk.msra.mxu2 %vm177_vm11, %v176_v22 }
 0x21a   :  { %592 = vmatpush.xpose.msk.msra.mxu1 %vm177_vm11, %v174_v24  ;;  %616 = vmatpush.xpose.msk.msra.mxu2 %vm177_vm11, %v174_v24 }
 0x21c   :  { %v255_v30 = vpop.permute.xlu1 %254 }
 0x21d   :  { %v261_v25 = vpop.permute.xlu0 %260 }
 0x21e   :  { %593 = vmatpush.xpose.msk.msra.mxu1 %vm177_vm11, %v172_v23  ;;  %617 = vmatpush.xpose.msk.msra.mxu2 %vm177_vm11, %v172_v23 }
 0x221   :  { %594 = vmatmul.msk.f32.vlgmr.msra.gmra.mxu1 %vm177_vm11, %v795_v17  ;;  %595 = vmatmul.msk.f32.vlgmr.msra.gmra.mxu2 %vm177_vm11, %v798_v19 }
 0x222   :  { %597 = vmatpush.xpose.msk.msrb.mxu2 %vm177_vm11, %v261_v25 }
 0x225   :  { %v251_v28 = vpop.permute.xlu0 %250 }
 0x226   :  { %598 = vmatpush.xpose.msk.msrb.mxu2 %vm177_vm11, %v259_v26 }
 0x229   :  { %596 = vmatmul.msk.f32.gmra.mxu2 %vm177_vm11, %v166_v21 }
 0x22a   :  { %599 = vmatpush.xpose.msk.msrb.mxu2 %vm177_vm11, %v257_v27 }
 0x231   :  { %600 = vmatmul.msk.f32.vlgmr.msrb.gmra.mxu2 %vm177_vm11, %v251_v28 }
 0x239   :  { %601 = vmatmul.msk.f32.gmra.mxu2 %vm177_vm11, %v253_v29 }
 0x241   :  { %602 = vmatmul.msk.f32.gmra.mxu2 %vm177_vm11, %v255_v30 }
 0x29e   :  { %v207_v37 = vpop.f32.mrf.mxu1 }
 0x29f   :  { %v208_v38 = vadd.f32 %v207_v37, %v34_v33 }
 0x2a1   :  { %v217_v42 = vsel %vm216_vm12, %v208_v38, -inf }
 0x2a4   :  { %v210_v31 = vpop.f32.mrf.mxu2 }
 0x2a5   :  { %v211_v44 = vadd.f32 %v210_v31, %v35_v39 }
 0x2a7   :  { %v220_v50 = vsel %vm216_vm12, %v211_v44, -inf }
 0x2ac   :  { %v213_v32 = vpop.f32.mrf.mxu2 }
 0x2ad   :  { %v214_v51 = vadd.f32 %v213_v32, %v36_v46 }
 0x2af   :  { %v223_v52 = vsel %vm216_vm12, %v214_v51, -inf }
 0x2b4   :  { %v291_v34 = vpop.f32.mrf.mxu2 }
 0x2b5   :  { %v292_v35 = vadd.f32 %v291_v34, %v34_v33 }
 0x2b7   :  { %v300_v36 = vsel %vm216_vm12, %v292_v35, -inf }
 0x2b8   :  { %301 = vmax.xlane.f32.xlu0 %v300_v36 }
 0x2bc   :  { %v294_v40 = vpop.f32.mrf.mxu2 }
 0x2bd   :  { %v295_v41 = vadd.f32 %v294_v40, %v35_v39 }
 0x2bf   :  { %v303_v43 = vsel %vm216_vm12, %v295_v41, -inf }
 0x2c0   :  { %218 = vmax.xlane.f32.xlu0 %v217_v42  ;;  %304 = vmax.xlane.f32.xlu2 %v303_v43 }
 0x2c4   :  { %v297_v47 = vpop.f32.mrf.mxu2 }
 0x2c5   :  { %v298_v48 = vadd.f32 %v297_v47, %v36_v46 }
 0x2c7   :  { %v306_v49 = vsel %vm216_vm12, %v298_v48, -inf }
 0x2c8   :  { %307 = vmax.xlane.f32.xlu1 %v306_v49  ;;  %221 = vmax.xlane.f32.xlu2 %v220_v50 }
 0x2d0   :  { %224 = vmax.xlane.f32.xlu1 %v223_v52 }
 0x2e0   :  { %628 = vrot.lane.b32.xlu2 %v627_v53, %s708_s9 }
 0x2e8   :  { %633 = vrot.lane.b32.xlu2 %v627_v53, %s709_s10 }
 0x32b   :  { %v302_v54 = vpop.xlane.xlu0 %301 }
 0x32c   :  { %v309_v55 = vsub.f32 %v292_v35, %v302_v54 }
 0x32e   :  { %v312_v56 = vmul.f32 1.442695, %v309_v55 }
 0x330   :  { %645 = vpow2.f32 %v312_v56  ;;  %v424_v56 = vperm.slane %v784_v45, 2 }
 0x333   :  { %v219_v57 = vpop.xlane.xlu0 %218  ;;  %v305_v58 = vpop.xlane.xlu2 %304 }
 0x334   :  { %v226_v59 = vsub.f32 %v208_v38, %v219_v57  ;;  %v310_v62 = vsub.f32 %v295_v41, %v305_v58 }
 0x336   :  { %v646_v60 = vpop.eup %645  ;;  %v229_v61 = vmul.f32 1.442695, %v226_v59  ;;  %v314_v2 = vmul.f32 1.442695, %v310_v62 }
 0x337   :  { %v318_v63 = vsel %vm216_vm12, %v646_v60, 0.0 }
 0x338   :  { %647 = vpow2.f32 %v229_v61  ;;  %319 = vadd.xlane.f32.xlu0 %v318_v63 }
 0x339   :  { %649 = vpow2.f32 %v314_v2 }
 0x33b   :  { %v308_v3 = vpop.xlane.xlu1 %307  ;;  %v222_v5 = vpop.xlane.xlu2 %221 }
 0x33c   :  { %v311_v7 = vsub.f32 %v298_v48, %v308_v3  ;;  %v227_v24 = vsub.f32 %v211_v44, %v222_v5 }
 0x33e   :  { %v648_v6 = vpop.eup %647  ;;  %v316_v9 = vmul.f32 1.442695, %v311_v7  ;;  %v231_v25 = vmul.f32 1.442695, %v227_v24  ;;  %v43_v24 = vld [vmem:[%s931_s2 + $0x30] sm:$0xff] }
 0x33f   :  { %v235_v8 = vsel %vm216_vm12, %v648_v6, 0.0  ;;  %v650_v13 = vpop.eup %649 }
 0x340   :  { %236 = vadd.xlane.f32.xlu1 %v235_v8  ;;  %651 = vpow2.f32 %v316_v9  ;;  %v321_v19 = vsel %vm216_vm12, %v650_v13, 0.0 }
 0x343   :  { %v225_v10 = vpop.xlane.xlu1 %224  ;;  %v629_v11 = vpop.permute.xlu2 %628 }
 0x344   :  { %v228_v14 = vsub.f32 %v214_v51, %v225_v10  ;;  %v630_v15 = vunpack.i.l.bf16 %v629_v11  ;;  %v631_v18 = vunpack.i.h.bf16 %v629_v11 }
 0x346   :  { %v233_v16 = vmul.f32 1.442695, %v228_v14  ;;  %364 = vmatpush.msra.mxu3 %v630_v15  ;;  %v652_v20 = vpop.eup %651 }
 0x347   :  { %v324_v23 = vsel %vm216_vm12, %v652_v20, 0.0 }
 0x348   :  { %653 = vpow2.f32 %v233_v16  ;;  %322 = vadd.xlane.f32.xlu1 %v321_v19  ;;  %365 = vmatpush.msra.mxu3 %v631_v18 }
 0x349   :  { %655 = vpow2.f32 %v231_v25  ;;  %v42_v25 = vld [vmem:[%s931_s2 + $0x28] sm:$0xff] }
 0x34b   :  { %v634_v32 = vpop.permute.xlu2 %633 }
 0x34c   :  { %333 = vrot.lane.b32.xlu0 %v795_v17, %s708_s9  ;;  %v635_v35 = vunpack.i.l.bf16 %v634_v32 }
 0x34e   :  { %v654_v21 = vpop.eup %653 }
 0x34f   :  { %v241_v22 = vsel %vm216_vm12, %v654_v21, 0.0  ;;  %v656_v26 = vpop.eup %655 }
 0x350   :  { %242 = vadd.xlane.f32.xlu2 %v241_v22  ;;  %325 = vadd.xlane.f32.xlu1 %v324_v23  ;;  %v238_v27 = vsel %vm216_vm12, %v656_v26, 0.0  ;;  %v44_v23 = vld [vmem:[%s931_s2 + $0x38] sm:$0xff] }
 0x351   :  { %524 = vmatpush.msrb.mxu0 %v44_v23 }
 0x353   :  { %525 = vmatpush.msrb.mxu0 %v43_v24 }
 0x355   :  { %526 = vmatpush.msrb.mxu0 %v42_v25 }
 0x369   :  { %377 = vrot.lane.b32.xlu1 %v795_v17, %s709_s10  ;;  %v636_v17 = vunpack.i.h.bf16 %v634_v32 }
 0x376   :  { %239 = vadd.xlane.f32.xlu0 %v238_v27 }
 0x3ab   :  { %v320_v28 = vpop.xlane.xlu0 %319 }
 0x3ac   :  { %657 = vrcp.f32 %v320_v28 }
 0x3b2   :  { %v658_v30 = vpop.eup %657 }
 0x3b3   :  { %v237_v29 = vpop.xlane.xlu1 %236  ;;  %v330_v34 = vmul.f32 %v658_v30, %v646_v60 }
 0x3bb   :  { %v323_v31 = vpop.xlane.xlu1 %322 }
 0x3bc   :  { %659 = vrcp.f32 %v323_v31 }
 0x3be   :  { %v334_v33 = vpop.permute.xlu0 %333 }
 0x3bf   :  { %366 = vmatpush.msra.mxu3 %v334_v33 }
 0x3c0   :  { %603 = vmatmul.msk.f32.vlgmr.msra.gmra.mxu3 %vm216_vm12, %v330_v34 }
 0x3c1   :  { %408 = vmatpush.msrb.mxu3 %v635_v35 }
 0x3c2   :  { %v660_v36 = vpop.eup %659 }
 0x3c3   :  { %409 = vmatpush.msrb.mxu3 %v636_v17  ;;  %v326_v37 = vpop.xlane.xlu1 %325  ;;  %v331_v38 = vmul.f32 %v660_v36, %v650_v13  ;;  %v243_v46 = vpop.xlane.xlu2 %242  ;;  %v494_v17 = vperm.slane %v784_v45, 3 }
 0x3c4   :  { %661 = vrcp.f32 %v326_v37 }
 0x3c5   :  { %663 = vrcp.f32 %v237_v29 }
 0x3c8   :  { %604 = vmatmul.msk.f32.gmra.mxu3 %vm216_vm12, %v331_v38 }
 0x3ca   :  { %v662_v39 = vpop.eup %661 }
 0x3cb   :  { %v332_v40 = vmul.f32 %v662_v39, %v652_v20  ;;  %v664_v41 = vpop.eup %663 }
 0x3cc   :  { %v247_v43 = vmul.f32 %v664_v41, %v648_v6 }
 0x3d0   :  { %605 = vmatmul.msk.f32.gmra.mxu3 %vm216_vm12, %v332_v40  ;;  %v498_v40 = vperm.slane %v784_v45, 4 }
 0x3db   :  { %v378_v42 = vpop.permute.xlu1 %377 }
 0x3dc   :  { %410 = vmatpush.msrb.mxu3 %v378_v42 }
 0x3dd   :  { %606 = vmatmul.msk.f32.vlgmr.msrb.gmra.mxu3 %vm216_vm12, %v247_v43 }
 0x3e9   :  { %v240_v44 = vpop.xlane.xlu0 %239 }
 0x3ea   :  { %665 = vrcp.f32 %v240_v44  ;;  %v48_v44 = vld [vmem:[%s931_s2 + $0x58] sm:$0xff] }
 0x3eb   :  { %667 = vrcp.f32 %v243_v46  ;;  %563 = vmatpush.msrb.mxu1 %v48_v44 }
 0x3f0   :  { %v666_v47 = vpop.eup %665 }
 0x3f1   :  { %v248_v48 = vmul.f32 %v666_v47, %v656_v26  ;;  %v668_v49 = vpop.eup %667  ;;  %v41_v26 = vld [vmem:[%s931_s2 + $0x20] sm:$0xff] }
 0x3f2   :  { %v249_v50 = vmul.f32 %v668_v49, %v654_v21  ;;  %527 = vmatpush.msrb.mxu0 %v41_v26 }
 0x3f3   :  { %607 = vmatmul.msk.f32.gmra.mxu3 %vm216_vm12, %v248_v48 }
 0x3fb   :  { %608 = vmatmul.msk.f32.gmra.mxu3 %vm216_vm12, %v249_v50 }
 0x443   :  { %v368_v51 = vpop.f32.mrf.mxu3 }
 0x44b   :  { %v371_v52 = vpop.f32.mrf.mxu3 }
 0x453   :  { %v374_v53 = vpop.f32.mrf.mxu3 }
 0x460   :  { %v412_v54 = vpop.f32.mrf.mxu3 }
 0x461   :  { %v413_v55 = vadd.f32 %v412_v54, %v368_v51 }
 0x463   :  { %v421_v57 = vadd.f32 %v413_v55, %v736_v0 }
 0x465   :  { %v849_v58 = vadd.f32 %v424_v56, %v421_v57 }
 0x467   :  { %v428_v59 = vsel %vm50_vm0, %v849_v58, 0.0 }
 0x468   :  { %429 = vadd.xlane.f32.xlu1 %v428_v59 }
 0x476   :  { %v415_v60 = vpop.f32.mrf.mxu3 }
 0x477   :  { %v416_v61 = vadd.f32 %v415_v60, %v371_v52 }
 0x479   :  { %v422_v62 = vadd.f32 %v416_v61, %v750_v4 }
 0x47b   :  { %v854_v63 = vadd.f32 %v424_v56, %v422_v62 }
 0x47d   :  { %v431_v2 = vsel %vm50_vm0, %v854_v63, 0.0 }
 0x47e   :  { %v418_v3 = vpop.f32.mrf.mxu3  ;;  %432 = vadd.xlane.f32.xlu0 %v431_v2 }
 0x47f   :  { %v419_v5 = vadd.f32 %v418_v3, %v374_v53 }
 0x481   :  { %v423_v0 = vadd.f32 %v419_v5, %v741_v1 }
 0x483   :  { %v859_v6 = vadd.f32 %v424_v56, %v423_v0 }
 0x485   :  { %v434_v7 = vsel %vm50_vm0, %v859_v6, 0.0 }
 0x486   :  { %435 = vadd.xlane.f32.xlu2 %v434_v7 }
 0x4db   :  { %v430_v8 = vpop.xlane.xlu1 %429 }
 0x4dc   :  { %v437_v9 = vmul.f32 %v430_v8, %v754_v12 }
 0x4de   :  { %v440_v4 = vsub.f32 %v849_v58, %v437_v9  ;;  %v47_v9 = vld [vmem:[%s931_s2 + $0x50] sm:$0xff] }
 0x4df   :  { %564 = vmatpush.msrb.mxu1 %v47_v9 }
 0x4e0   :  { %v443_v10 = vmul.f32 %v440_v4, %v440_v4 }
 0x4e2   :  { %v446_v11 = vsel %vm50_vm0, %v443_v10, 0.0  ;;  %v45_v10 = vld [vmem:[%s931_s2 + $0x40] sm:$0xff] }
 0x4e3   :  { %447 = vadd.xlane.f32.xlu0 %v446_v11  ;;  %v502_v11 = vperm.slane %v784_v45, 5 }
 0x4f1   :  { %v433_v13 = vpop.xlane.xlu0 %432 }
 0x4f2   :  { %v438_v14 = vmul.f32 %v433_v13, %v754_v12 }
 0x4f4   :  { %v441_v1 = vsub.f32 %v854_v63, %v438_v14 }
 0x4f6   :  { %v444_v15 = vmul.f32 %v441_v1, %v441_v1 }
 0x4f8   :  { %v449_v16 = vsel %vm50_vm0, %v444_v15, 0.0 }
 0x4f9   :  { %v436_v18 = vpop.xlane.xlu2 %435  ;;  %450 = vadd.xlane.f32.xlu2 %v449_v16 }
 0x4fa   :  { %v439_v19 = vmul.f32 %v436_v18, %v754_v12 }
 0x4fc   :  { %v871_v20 = vsub.f32 %v859_v6, %v439_v19 }
 0x4fe   :  { %v445_v21 = vmul.f32 %v871_v20, %v871_v20 }
 0x500   :  { %v452_v22 = vsel %vm50_vm0, %v445_v21, 0.0 }
 0x501   :  { %453 = vadd.xlane.f32.xlu0 %v452_v22  ;;  %v541_v22 = vperm.slane %v784_v45, 6 }
 0x556   :  { %v448_v27 = vpop.xlane.xlu0 %447 }
 0x557   :  { %v455_v28 = vmul.f32 %v448_v27, %v754_v12 }
 0x559   :  { %v458_v29 = vadd.f32 1e-05, %v455_v28 }
 0x55b   :  { %669 = vrsqrt.f32 %v458_v29  ;;  %vm467_vm14 = vweird.f32 %v458_v29 }
 0x561   :  { %v670_v30 = vpop.eup %669 }
 0x562   :  { %v462_v31 = vmul.f32 %v670_v30, %v458_v29  ;;  %vm468_vm13 = vweird.f32 %v670_v30 }
 0x563   :  { %vm469_vm15 = vmor %vm467_vm14, %vm468_vm13 }
 0x564   :  { %v463_v32 = vmul.f32 %v670_v30, %v462_v31 }
 0x566   :  { %v464_v33 = vmul.f32 0.5, %v463_v32 }
 0x568   :  { %v465_v34 = vsub.f32 1.5, %v464_v33 }
 0x56a   :  { %v466_v35 = vmul.f32 %v670_v30, %v465_v34 }
 0x56c   :  { %v470_v36 = vsel %vm469_vm15, %v670_v30, %v466_v35  ;;  %v451_v37 = vpop.xlane.xlu2 %450 }
 0x56d   :  { %v491_v38 = vmul.f32 %v470_v36, %v440_v4  ;;  %v456_v39 = vmul.f32 %v451_v37, %v754_v12  ;;  %v46_v4 = vld [vmem:[%s931_s2 + $0x48] sm:$0xff] }
 0x56e   :  { %565 = vmatpush.msrb.mxu1 %v46_v4 }
 0x56f   :  { %v459_v41 = vadd.f32 1e-05, %v456_v39  ;;  %v495_v42 = vmul.f32 %v494_v17, %v491_v38 }
 0x570   :  { %566 = vmatpush.msrb.mxu1 %v45_v10 }
 0x571   :  { %671 = vrsqrt.f32 %v459_v41  ;;  %v499_v43 = vadd.f32 %v498_v40, %v495_v42  ;;  %vm477_vm2 = vweird.f32 %v459_v41 }
 0x573   :  { %609 = vmatmul.msk.f32.vlgmr.msrb.gmra.mxu0 %vm50_vm0, %v499_v43 }
 0x574   :  { %v454_v46 = vpop.xlane.xlu0 %453 }
 0x575   :  { %v457_v47 = vmul.f32 %v454_v46, %v754_v12 }
 0x577   :  { %v672_v48 = vpop.eup %671  ;;  %v460_v49 = vadd.f32 1e-05, %v457_v47 }
 0x578   :  { %v472_v50 = vmul.f32 %v672_v48, %v459_v41  ;;  %vm478_vm1 = vweird.f32 %v672_v48 }
 0x579   :  { %673 = vrsqrt.f32 %v460_v49  ;;  %vm479_vm3 = vmor %vm477_vm2, %vm478_vm1  ;;  %vm487_vm5 = vweird.f32 %v460_v49 }
 0x57a   :  { %v473_v51 = vmul.f32 %v672_v48, %v472_v50 }
 0x57c   :  { %v474_v52 = vmul.f32 0.5, %v473_v51 }
 0x57e   :  { %v475_v53 = vsub.f32 1.5, %v474_v52 }
 0x57f   :  { %v674_v54 = vpop.eup %673 }
 0x580   :  { %v476_v55 = vmul.f32 %v672_v48, %v475_v53  ;;  %v482_v56 = vmul.f32 %v674_v54, %v460_v49  ;;  %vm488_vm4 = vweird.f32 %v674_v54 }
 0x581   :  { %vm489_vm6 = vmor %vm487_vm5, %vm488_vm4 }
 0x582   :  { %v480_v57 = vsel %vm479_vm3, %v672_v48, %v476_v55  ;;  %v483_v59 = vmul.f32 %v674_v54, %v482_v56 }
 0x583   :  { %v492_v60 = vmul.f32 %v480_v57, %v441_v1 }
 0x584   :  { %v484_v61 = vmul.f32 0.5, %v483_v59 }
 0x585   :  { %v496_v62 = vmul.f32 %v494_v17, %v492_v60 }
 0x586   :  { %v485_v2 = vsub.f32 1.5, %v484_v61 }
 0x587   :  { %v500_v12 = vadd.f32 %v498_v40, %v496_v62 }
 0x588   :  { %v486_v3 = vmul.f32 %v674_v54, %v485_v2 }
 0x589   :  { %610 = vmatmul.msk.f32.gmra.mxu0 %vm50_vm0, %v500_v12 }
 0x58a   :  { %v490_v5 = vsel %vm489_vm6, %v674_v54, %v486_v3 }
 0x58b   :  { %v493_v0 = vmul.f32 %v490_v5, %v871_v20 }
 0x58d   :  { %v497_v7 = vmul.f32 %v494_v17, %v493_v0 }
 0x58f   :  { %v501_v8 = vadd.f32 %v498_v40, %v497_v7 }
 0x591   :  { %611 = vmatmul.msk.f32.gmra.mxu0 %vm50_vm0, %v501_v8 }
 0x5f0   :  { %v529_v13 = vpop.f32.mrf.mxu0 }
 0x5f1   :  { %v530_v14 = vadd.f32 %v529_v13, %v502_v11 }
 0x5f3   :  { %v538_v1 = vmax.f32 %v530_v14, 0.0 }
 0x5f5   :  { %612 = vmatmul.msk.f32.vlgmr.msrb.gmra.mxu1 %vm50_vm0, %v538_v1 }
 0x606   :  { %v532_v15 = vpop.f32.mrf.mxu0 }
 0x607   :  { %v533_v16 = vadd.f32 %v532_v15, %v502_v11 }
 0x609   :  { %v539_v18 = vmax.f32 %v533_v16, 0.0 }
 0x60b   :  { %613 = vmatmul.msk.f32.gmra.mxu1 %vm50_vm0, %v539_v18 }
 0x60e   :  { %v535_v19 = vpop.f32.mrf.mxu0 }
 0x60f   :  { %v536_v20 = vadd.f32 %v535_v19, %v502_v11 }
 0x611   :  { %v540_v21 = vmax.f32 %v536_v20, 0.0 }
 0x613   :  { %614 = vmatmul.msk.f32.gmra.mxu1 %vm50_vm0, %v540_v21 }
 0x672   :  { %v568_v23 = vpop.f32.mrf.mxu1 }
 0x673   :  { %v569_v24 = vadd.f32 %v568_v23, %v541_v22 }
 0x675   :  { %v577_v25 = vadd.f32 %v569_v24, %v849_v58 }
 0x677   :  { %580 = vst.msk [vmem:[%s932_s3] sm:$0xff] %vm50_vm0, %v577_v25 }
 0x688   :  { %v571_v26 = vpop.f32.mrf.mxu1 }
 0x689   :  { %v572_v27 = vadd.f32 %v571_v26, %v541_v22 }
 0x68b   :  { %v578_v28 = vadd.f32 %v572_v27, %v854_v63 }
 0x68d   :  { %581 = vst.msk [vmem:[%s932_s3 + $0x8] sm:$0xff] %vm50_vm0, %v578_v28 }
 0x690   :  { %v574_v29 = vpop.f32.mrf.mxu1 }
 0x691   :  { %v575_v45 = vadd.f32 %v574_v29, %v541_v22 }
 0x693   :  { %v579_v30 = vadd.f32 %v575_v45, %v859_v6 }
 0x695   :  { %582 = vst.msk [vmem:[%s932_s3 + $0x10] sm:$0xff] %vm50_vm0, %v579_v30 }
 0x696   :  { %587 = vsyncpa [#allocation3], 1 }

</bundles_post_ra>
